<compile_context>
chip_gen: v5e
topology: v5e:2x2
jax: 0.10.0
libtpu: 0.0.40
codegen_flags: <defaults>
</compile_context>

<pallas_src>
import jax
import jax.numpy as jnp
from jax.experimental import pallas as pl


def _scale_mul_kernel(scale_ref, x_ref, o_ref):
    # scale_ref: (N*C, 1), x_ref/o_ref: (N*C, H*W).
    # Per-channel scale broadcast along the lane (spatial) axis; pure VPU work,
    # single grid step, entirely DMA-bound.
    o_ref[...] = scale_ref[...] * x_ref[...]


def layer_scale_mul(scale, x):
    """scale: (C, 1, 1) f32, x: (N, C, H, W) f32 -> (N, C, H, W) f32."""
    n, c, h, w = x.shape
    hw = h * w

    # Free reshapes: NCHW -> (N*C, H*W); scale -> one column entry per (n, c) row.
    x2 = x.reshape(n * c, hw)
    s2 = jnp.broadcast_to(scale.reshape(1, c, 1), (n, c, 1)).reshape(n * c, 1)

    out2 = pl.pallas_call(
        _scale_mul_kernel,
        out_shape=jax.ShapeDtypeStruct((n * c, hw), x.dtype),
        grid=(1,),  # single step: whole arrays (~1.2 MB) fit trivially in VMEM
        in_specs=[
            pl.BlockSpec((n * c, 1), lambda i: (0, 0)),
            pl.BlockSpec((n * c, hw), lambda i: (0, 0)),
        ],
        out_specs=pl.BlockSpec((n * c, hw), lambda i: (0, 0)),
        # In-place: output aliases x2. Free when the caller donates x;
        # otherwise XLA inserts a defensive copy (still correct).
        input_output_aliases={1: 0},
    )(s2, x2)

    return out2.reshape(n, c, h, w)


if __name__ == "__main__":
    key = jax.random.PRNGKey(0)
    k_scale, k_x = jax.random.split(key)

    C, H, W = 768, 14, 14
    # torch.rand -> uniform [0, 1); torch.randn -> standard normal
    layer_scale7 = jax.random.uniform(k_scale, (C, 1, 1), dtype=jnp.float32)
    x103 = jax.random.normal(k_x, (1, C, H, W), dtype=jnp.float32)

    # Reference (same semantics as the PyTorch broadcast multiply), computed
    # BEFORE the kernel call since x103's buffer is donated for the in-place
    # alias.
    ref = layer_scale7 * x103

    run = jax.jit(layer_scale_mul, donate_argnums=1)
    out = jax.block_until_ready(run(layer_scale7, x103))

    assert out.shape == (1, C, H, W)
    assert jnp.allclose(out, ref, rtol=1e-6, atol=0.0)

    print("KERNEL_OK")
</pallas_src>

<mosaic_0001>
module attributes {stable_mosaic.version = 11 : i64} {
  func.func @_scale_mul_kernel(%arg0: i32, %arg1: memref<768x1xf32, #tpu.memory_space<vmem>>, %arg2: memref<768x196xf32, #tpu.memory_space<vmem>>, %arg3: memref<768x196xf32, #tpu.memory_space<vmem>>) attributes {dimension_semantics = [#tpu.dimension_semantics<arbitrary>], iteration_bounds = array<i64: 1>, scalar_prefetch = 0 : i64, scratch_operands = 0 : i64, tpu.core_type = #tpu.core_type<tc>, window_params = [{pipeline_mode = #tpu.pipeline_mode<synchronous>, transform_indices = @transform_0, window_bounds = array<i64: 768, 1>}, {pipeline_mode = #tpu.pipeline_mode<synchronous>, transform_indices = @transform_1, window_bounds = array<i64: 768, 196>}, {pipeline_mode = #tpu.pipeline_mode<synchronous>, transform_indices = @transform_2, window_bounds = array<i64: 768, 196>}]} {
    %c0 = arith.constant 0 : index
    %c0_0 = arith.constant 0 : index
    %0 = vector.load %arg1[%c0, %c0_0] : memref<768x1xf32, #tpu.memory_space<vmem>>, vector<768x1xf32>
    %c0_1 = arith.constant 0 : index
    %c0_2 = arith.constant 0 : index
    %1 = vector.load %arg2[%c0_1, %c0_2] : memref<768x196xf32, #tpu.memory_space<vmem>>, vector<768x196xf32>
    %2 = vector.broadcast %0 : vector<768x1xf32> to vector<768x196xf32>
    %3 = arith.mulf %2, %1 : vector<768x196xf32>
    %c0_3 = arith.constant 0 : index
    %c0_4 = arith.constant 0 : index
    %4 = vector.load %arg3[%c0_3, %c0_4] : memref<768x196xf32, #tpu.memory_space<vmem>>, vector<768x196xf32>
    tpu.vector_store %arg3[%c0_3, %c0_4], %3 {strides = array<i32>} : memref<768x196xf32, #tpu.memory_space<vmem>>, vector<768x196xf32>,
    return
  }
  func.func @transform_0(%arg0: i32) -> (i32, i32) {
    %c0_i32 = arith.constant 0 : i32
    %c0_i32_0 = arith.constant 0 : i32
    %c0_i32_1 = arith.constant 0 : i32
    return %c0_i32, %c0_i32_0 : i32, i32
  }
  func.func @transform_1(%arg0: i32) -> (i32, i32) {
    %c0_i32 = arith.constant 0 : i32
    %c0_i32_0 = arith.constant 0 : i32
    %c0_i32_1 = arith.constant 0 : i32
    return %c0_i32, %c0_i32_0 : i32, i32
  }
  func.func @transform_2(%arg0: i32) -> (i32, i32) {
    %c0_i32 = arith.constant 0 : i32
    %c0_i32_0 = arith.constant 0 : i32
    %c0_i32_1 = arith.constant 0 : i32
    return %c0_i32, %c0_i32_0 : i32, i32
  }
}

</mosaic_0001>

<bundles_post_ra>
// kernel: layer_scale_mul.1
= control target key start
LH: loop header
LB: loop body
LE: loop exit
PB: predicated region body
PF: predicated region fallthrough
CT: control target
= control target key end

     0   :  { %v1172_v0 = vmov 0   ;;  %vm972_vm0 = vcmask 556032   ;;  %s2724_s0 = inlined_call_operand.vmem [shape: f32[768,1], index: 0, kind: input, shape index: {}]   ;;  %s2725_s1 = inlined_call_operand.vmem [shape: f32[768,196], index: 1, kind: input, shape index: {}, may-alias: {1,2}]   ;;  %s2726_s2 = inlined_call_operand.vmem [shape: f32[768,196], index: 2, kind: output, shape index: {}, may-alias: {1,2}]  }
   0x1   :  { %1171 = vset.pattern.permute.xlu2 %v1172_v0  ;;  %1170 = vset.pattern.permute.xlu1 %v1172_v0  ;;  %v15_v1 = vld [vmem:[%s2724_s0 + $0x20] sm:$0xff]  ;;  %v13_v2 = vld [vmem:[%s2724_s0 + $0x10] sm:$0xff]  ;;  %v16_v4 = vld [vmem:[%s2724_s0 + $0x28] sm:$0xff] }
   0x2   :  { %v11_v3 = vld [vmem:[%s2724_s0] sm:$0xff]  ;;  %1169 = vset.pattern.permute.xlu0 %v1172_v0  ;;  %321 = vperm.xlu2 %1171, %v15_v1   ;;  %v14_v5 = vld [vmem:[%s2724_s0 + $0x18] sm:$0xff]  ;;  %v12_v6 = vld [vmem:[%s2724_s0 + $0x8] sm:$0xff] }
   0x3   :  { %311 = vperm.xlu1 %1170, %v13_v2   ;;  %301 = vperm.xlu0 %1169, %v11_v3   ;;  %v19_v7 = vld [vmem:[%s2724_s0 + $0x40] sm:$0xff]  ;;  %v18_v8 = vld [vmem:[%s2724_s0 + $0x38] sm:$0xff]  ;;  %v17_v9 = vld [vmem:[%s2724_s0 + $0x30] sm:$0xff] }
   0x4   :  { %v22_v10 = vld [vmem:[%s2724_s0 + $0x58] sm:$0xff]  ;;  %v21_v11 = vld [vmem:[%s2724_s0 + $0x50] sm:$0xff]  ;;  %v20_v12 = vld [vmem:[%s2724_s0 + $0x48] sm:$0xff] }
   0x5   :  { %v25_v13 = vld [vmem:[%s2724_s0 + $0x70] sm:$0xff]  ;;  %v24_v14 = vld [vmem:[%s2724_s0 + $0x68] sm:$0xff]  ;;  %v23_v15 = vld [vmem:[%s2724_s0 + $0x60] sm:$0xff] }
   0x6   :  { %v28_v16 = vld [vmem:[%s2724_s0 + $0x88] sm:$0xff]  ;;  %v27_v17 = vld [vmem:[%s2724_s0 + $0x80] sm:$0xff]  ;;  %v26_v18 = vld [vmem:[%s2724_s0 + $0x78] sm:$0xff] }
   0x7   :  { %v31_v19 = vld [vmem:[%s2724_s0 + $0xa0] sm:$0xff]  ;;  %v30_v20 = vld [vmem:[%s2724_s0 + $0x98] sm:$0xff]  ;;  %v29_v21 = vld [vmem:[%s2724_s0 + $0x90] sm:$0xff] }
   0x8   :  { %v34_v22 = vld [vmem:[%s2724_s0 + $0xb8] sm:$0xff]  ;;  %v33_v23 = vld [vmem:[%s2724_s0 + $0xb0] sm:$0xff]  ;;  %v32_v24 = vld [vmem:[%s2724_s0 + $0xa8] sm:$0xff] }
   0x9   :  { %v37_v25 = vld [vmem:[%s2724_s0 + $0xd0] sm:$0xff]  ;;  %v36_v26 = vld [vmem:[%s2724_s0 + $0xc8] sm:$0xff]  ;;  %v35_v27 = vld [vmem:[%s2724_s0 + $0xc0] sm:$0xff] }
   0xa   :  { %326 = vperm.xlu2 %1171, %v16_v4   ;;  %v40_v28 = vld [vmem:[%s2724_s0 + $0xe8] sm:$0xff]  ;;  %v39_v29 = vld [vmem:[%s2724_s0 + $0xe0] sm:$0xff]  ;;  %v38_v30 = vld [vmem:[%s2724_s0 + $0xd8] sm:$0xff] }
   0xb   :  { %316 = vperm.xlu1 %1170, %v14_v5   ;;  %306 = vperm.xlu0 %1169, %v12_v6   ;;  %v43_v31 = vld [vmem:[%s2724_s0 + $0x100] sm:$0xff]  ;;  %v42_v32 = vld [vmem:[%s2724_s0 + $0xf8] sm:$0xff]  ;;  %v41_v33 = vld [vmem:[%s2724_s0 + $0xf0] sm:$0xff] }
   0xc   :  { %v46_v34 = vld [vmem:[%s2724_s0 + $0x118] sm:$0xff]  ;;  %v45_v35 = vld [vmem:[%s2724_s0 + $0x110] sm:$0xff]  ;;  %v44_v36 = vld [vmem:[%s2724_s0 + $0x108] sm:$0xff] }
   0xd   :  { %v115_v37 = vld [vmem:[%s2725_s1 + $0x40] sm:$0xff]  ;;  %v116_v38 = vld [vmem:[%s2725_s1 + $0x48] sm:$0xff]  ;;  %v49_v42 = vld [vmem:[%s2724_s0 + $0x130] sm:$0xff] }
   0xe   :  { %v48_v43 = vld [vmem:[%s2724_s0 + $0x128] sm:$0xff]  ;;  %v47_v44 = vld [vmem:[%s2724_s0 + $0x120] sm:$0xff]  ;;  %v50_v52 = vld [vmem:[%s2724_s0 + $0x138] sm:$0xff] }
   0xf   :  { %v52_v50 = vld [vmem:[%s2724_s0 + $0x148] sm:$0xff]  ;;  %v51_v51 = vld [vmem:[%s2724_s0 + $0x140] sm:$0xff]  ;;  %v54_v59 = vld [vmem:[%s2724_s0 + $0x158] sm:$0xff] }
  0x10   :  { %v55_v58 = vld [vmem:[%s2724_s0 + $0x160] sm:$0xff]  ;;  %v53_v60 = vld [vmem:[%s2724_s0 + $0x150] sm:$0xff] }
  0x12   :  { %341 = vperm.xlu2 %1171, %v19_v7  }
  0x13   :  { %336 = vperm.xlu1 %1170, %v18_v8   ;;  %331 = vperm.xlu0 %1169, %v17_v9  }
  0x1a   :  { %356 = vperm.xlu2 %1171, %v22_v10  }
  0x1b   :  { %351 = vperm.xlu1 %1170, %v21_v11   ;;  %346 = vperm.xlu0 %1169, %v20_v12   ;;  %v58_v11 = vld [vmem:[%s2724_s0 + $0x178] sm:$0xff] }
  0x22   :  { %371 = vperm.xlu2 %1171, %v25_v13   ;;  %v57_v13 = vld [vmem:[%s2724_s0 + $0x170] sm:$0xff] }
  0x23   :  { %366 = vperm.xlu1 %1170, %v24_v14   ;;  %361 = vperm.xlu0 %1169, %v23_v15   ;;  %v56_v14 = vld [vmem:[%s2724_s0 + $0x168] sm:$0xff] }
  0x2a   :  { %386 = vperm.xlu2 %1171, %v28_v16  }
  0x2b   :  { %381 = vperm.xlu1 %1170, %v27_v17   ;;  %376 = vperm.xlu0 %1169, %v26_v18  }
  0x32   :  { %401 = vperm.xlu2 %1171, %v31_v19  }
  0x33   :  { %396 = vperm.xlu1 %1170, %v30_v20   ;;  %391 = vperm.xlu0 %1169, %v29_v21  }
  0x3a   :  { %416 = vperm.xlu2 %1171, %v34_v22  }
  0x3b   :  { %411 = vperm.xlu1 %1170, %v33_v23   ;;  %406 = vperm.xlu0 %1169, %v32_v24  }
  0x42   :  { %431 = vperm.xlu2 %1171, %v37_v25  }
  0x43   :  { %426 = vperm.xlu1 %1170, %v36_v26   ;;  %421 = vperm.xlu0 %1169, %v35_v27  }
  0x4a   :  { %446 = vperm.xlu2 %1171, %v40_v28  }
  0x4b   :  { %441 = vperm.xlu1 %1170, %v39_v29   ;;  %436 = vperm.xlu0 %1169, %v38_v30   ;;  %v61_v29 = vld [vmem:[%s2724_s0 + $0x190] sm:$0xff] }
  0x52   :  { %461 = vperm.xlu2 %1171, %v43_v31   ;;  %v60_v31 = vld [vmem:[%s2724_s0 + $0x188] sm:$0xff] }
  0x53   :  { %456 = vperm.xlu1 %1170, %v42_v32   ;;  %451 = vperm.xlu0 %1169, %v41_v33   ;;  %v59_v32 = vld [vmem:[%s2724_s0 + $0x180] sm:$0xff] }
  0x5a   :  { %476 = vperm.xlu2 %1171, %v46_v34  }
  0x5b   :  { %471 = vperm.xlu1 %1170, %v45_v35   ;;  %466 = vperm.xlu0 %1169, %v44_v36  }
  0x5c   :  { %v322_v39 = vpop.permute.xlu2 %321 }
  0x5d   :  { %v787_v40 = vmul.f32 %v322_v39, %v115_v37  ;;  %v788_v41 = vmul.f32 %v322_v39, %v116_v38 }
  0x5f   :  { %980 = vst [vmem:[%s2726_s2 + $0x40] sm:$0xff] %v787_v40 }
  0x60   :  { %981 = vst.msk [vmem:[%s2726_s2 + $0x48] sm:$0xff] %vm972_vm0, %v788_v41 }
  0x62   :  { %491 = vperm.xlu2 %1171, %v49_v42  }
  0x63   :  { %486 = vperm.xlu1 %1170, %v48_v43   ;;  %481 = vperm.xlu0 %1169, %v47_v44  }
  0x64   :  { %v327_v47 = vpop.permute.xlu2 %326 }
  0x67   :  { %v117_v45 = vld [vmem:[%s2725_s1 + $0x50] sm:$0xff]  ;;  %v118_v46 = vld [vmem:[%s2725_s1 + $0x58] sm:$0xff] }
  0x68   :  { %v789_v48 = vmul.f32 %v327_v47, %v117_v45  ;;  %v790_v49 = vmul.f32 %v327_v47, %v118_v46  ;;  %v64_v47 = vld [vmem:[%s2724_s0 + $0x1a8] sm:$0xff] }
  0x6a   :  { %982 = vst [vmem:[%s2726_s2 + $0x50] sm:$0xff] %v789_v48  ;;  %506 = vperm.xlu2 %1171, %v52_v50   ;;  %v62_v50 = vld [vmem:[%s2724_s0 + $0x198] sm:$0xff] }
  0x6b   :  { %983 = vst.msk [vmem:[%s2726_s2 + $0x58] sm:$0xff] %vm972_vm0, %v790_v49  ;;  %501 = vperm.xlu1 %1170, %v51_v51   ;;  %496 = vperm.xlu0 %1169, %v50_v52   ;;  %v63_v49 = vld [vmem:[%s2724_s0 + $0x1a0] sm:$0xff] }
  0x6c   :  { %v342_v55 = vpop.permute.xlu2 %341 }
  0x72   :  { %v123_v53 = vld [vmem:[%s2725_s1 + $0x80] sm:$0xff]  ;;  %v124_v54 = vld [vmem:[%s2725_s1 + $0x88] sm:$0xff]  ;;  %521 = vperm.xlu2 %1171, %v55_v58  }
  0x73   :  { %v795_v56 = vmul.f32 %v342_v55, %v123_v53  ;;  %v796_v57 = vmul.f32 %v342_v55, %v124_v54  ;;  %516 = vperm.xlu1 %1170, %v54_v59   ;;  %511 = vperm.xlu0 %1169, %v53_v60  }
  0x74   :  { %v357_v1 = vpop.permute.xlu2 %356 }
  0x75   :  { %988 = vst [vmem:[%s2726_s2 + $0x80] sm:$0xff] %v795_v56  ;;  %v312_v5 = vpop.permute.xlu1 %311  ;;  %v302_v7 = vpop.permute.xlu0 %301 }
  0x76   :  { %989 = vst.msk [vmem:[%s2726_s2 + $0x88] sm:$0xff] %vm972_vm0, %v796_v57 }
  0x7a   :  { %536 = vperm.xlu2 %1171, %v58_v11  }
  0x7b   :  { %531 = vperm.xlu1 %1170, %v57_v13   ;;  %526 = vperm.xlu0 %1169, %v56_v14  }
  0x7c   :  { %v372_v19 = vpop.permute.xlu2 %371 }
  0x7d   :  { %v129_v61 = vld [vmem:[%s2725_s1 + $0xb0] sm:$0xff]  ;;  %v130_v62 = vld [vmem:[%s2725_s1 + $0xb8] sm:$0xff]  ;;  %v111_v63 = vld [vmem:[%s2725_s1 + $0x20] sm:$0xff]  ;;  %v317_v23 = vpop.permute.xlu1 %316  ;;  %v307_v25 = vpop.permute.xlu0 %306 }
  0x7e   :  { %v112_v0 = vld [vmem:[%s2725_s1 + $0x28] sm:$0xff]  ;;  %v107_v2 = vld [vmem:[%s2725_s1] sm:$0xff]  ;;  %v801_v3 = vmul.f32 %v357_v1, %v129_v61  ;;  %v802_v4 = vmul.f32 %v357_v1, %v130_v62  ;;  %v783_v8 = vmul.f32 %v312_v5, %v111_v63 }
  0x7f   :  { %v108_v6 = vld [vmem:[%s2725_s1 + $0x8] sm:$0xff]  ;;  %v784_v9 = vmul.f32 %v312_v5, %v112_v0  ;;  %v779_v10 = vmul.f32 %v302_v7, %v107_v2  ;;  %v67_v1 = vld [vmem:[%s2724_s0 + $0x1c0] sm:$0xff] }
  0x80   :  { %994 = vst [vmem:[%s2726_s2 + $0xb0] sm:$0xff] %v801_v3  ;;  %v780_v12 = vmul.f32 %v302_v7, %v108_v6  ;;  %v66_v3 = vld [vmem:[%s2724_s0 + $0x1b8] sm:$0xff] }
  0x81   :  { %995 = vst.msk [vmem:[%s2726_s2 + $0xb8] sm:$0xff] %vm972_vm0, %v802_v4  ;;  %v65_v4 = vld [vmem:[%s2724_s0 + $0x1b0] sm:$0xff] }
  0x82   :  { %976 = vst [vmem:[%s2726_s2 + $0x20] sm:$0xff] %v783_v8  ;;  %551 = vperm.xlu2 %1171, %v61_v29  }
  0x83   :  { %977 = vst.msk [vmem:[%s2726_s2 + $0x28] sm:$0xff] %vm972_vm0, %v784_v9  ;;  %546 = vperm.xlu1 %1170, %v60_v31   ;;  %541 = vperm.xlu0 %1169, %v59_v32  }
  0x84   :  { %v387_v37 = vpop.permute.xlu2 %386 }
  0x85   :  { %v337_v41 = vpop.permute.xlu1 %336  ;;  %v332_v43 = vpop.permute.xlu0 %331 }
  0x8a   :  { %v135_v15 = vld [vmem:[%s2725_s1 + $0xe0] sm:$0xff]  ;;  %v136_v16 = vld [vmem:[%s2725_s1 + $0xe8] sm:$0xff]  ;;  %566 = vperm.xlu2 %1171, %v64_v47  }
  0x8b   :  { %971 = vst [vmem:[%s2726_s2] sm:$0xff] %v779_v10  ;;  %v807_v21 = vmul.f32 %v372_v19, %v135_v15  ;;  %v808_v22 = vmul.f32 %v372_v19, %v136_v16  ;;  %561 = vperm.xlu1 %1170, %v63_v49   ;;  %556 = vperm.xlu0 %1169, %v62_v50   ;;  %v70_v19 = vld [vmem:[%s2724_s0 + $0x1d8] sm:$0xff] }
  0x8c   :  { %v402_v55 = vpop.permute.xlu2 %401 }
  0x8d   :  { %v352_v59 = vpop.permute.xlu1 %351  ;;  %v347_v61 = vpop.permute.xlu0 %346 }
  0x92   :  { %v113_v17 = vld [vmem:[%s2725_s1 + $0x30] sm:$0xff]  ;;  %v114_v18 = vld [vmem:[%s2725_s1 + $0x38] sm:$0xff]  ;;  %581 = vperm.xlu2 %1171, %v67_v1  }
  0x93   :  { %973 = vst.msk [vmem:[%s2726_s2 + $0x8] sm:$0xff] %vm972_vm0, %v780_v12  ;;  %v785_v26 = vmul.f32 %v317_v23, %v113_v17  ;;  %v786_v27 = vmul.f32 %v317_v23, %v114_v18  ;;  %576 = vperm.xlu1 %1170, %v66_v3   ;;  %571 = vperm.xlu0 %1169, %v65_v4  }
  0x94   :  { %v417_v9 = vpop.permute.xlu2 %416 }
  0x95   :  { %v367_v13 = vpop.permute.xlu1 %366  ;;  %v362_v15 = vpop.permute.xlu0 %361 }
  0x9a   :  { %v109_v20 = vld [vmem:[%s2725_s1 + $0x10] sm:$0xff]  ;;  %v110_v24 = vld [vmem:[%s2725_s1 + $0x18] sm:$0xff]  ;;  %596 = vperm.xlu2 %1171, %v70_v19  }
  0x9b   :  { %1000 = vst [vmem:[%s2726_s2 + $0xe0] sm:$0xff] %v807_v21  ;;  %v781_v28 = vmul.f32 %v307_v25, %v109_v20  ;;  %v782_v30 = vmul.f32 %v307_v25, %v110_v24  ;;  %v69_v21 = vld [vmem:[%s2724_s0 + $0x1d0] sm:$0xff] }
  0x9c   :  { %1001 = vst.msk [vmem:[%s2726_s2 + $0xe8] sm:$0xff] %vm972_vm0, %v808_v22  ;;  %v68_v22 = vld [vmem:[%s2724_s0 + $0x1c8] sm:$0xff]  ;;  %591 = vperm.xlu1 %1170, %v69_v21  }
  0x9d   :  { %978 = vst [vmem:[%s2726_s2 + $0x30] sm:$0xff] %v785_v26  ;;  %586 = vperm.xlu0 %1169, %v68_v22   ;;  %v382_v31 = vpop.permute.xlu1 %381 }
  0x9e   :  { %979 = vst.msk [vmem:[%s2726_s2 + $0x38] sm:$0xff] %vm972_vm0, %v786_v27  ;;  %v432_v27 = vpop.permute.xlu2 %431 }
  0xa5   :  { %v141_v33 = vld [vmem:[%s2725_s1 + $0x110] sm:$0xff]  ;;  %v142_v34 = vld [vmem:[%s2725_s1 + $0x118] sm:$0xff]  ;;  %v397_v49 = vpop.permute.xlu1 %396 }
  0xa6   :  { %974 = vst [vmem:[%s2726_s2 + $0x10] sm:$0xff] %v781_v28  ;;  %v813_v39 = vmul.f32 %v387_v37, %v141_v33  ;;  %v814_v40 = vmul.f32 %v387_v37, %v142_v34  ;;  %v377_v33 = vpop.permute.xlu0 %376  ;;  %v73_v37 = vld [vmem:[%s2724_s0 + $0x1f0] sm:$0xff] }
  0xa7   :  { %611 = vperm.xlu2 %1171, %v73_v37  }
  0xad   :  { %v121_v35 = vld [vmem:[%s2725_s1 + $0x70] sm:$0xff]  ;;  %v122_v36 = vld [vmem:[%s2725_s1 + $0x78] sm:$0xff]  ;;  %v412_v3 = vpop.permute.xlu1 %411 }
  0xae   :  { %975 = vst.msk [vmem:[%s2726_s2 + $0x18] sm:$0xff] %vm972_vm0, %v782_v30  ;;  %v793_v44 = vmul.f32 %v337_v41, %v121_v35  ;;  %v794_v45 = vmul.f32 %v337_v41, %v122_v36 }
  0xb5   :  { %v119_v38 = vld [vmem:[%s2725_s1 + $0x60] sm:$0xff]  ;;  %v120_v42 = vld [vmem:[%s2725_s1 + $0x68] sm:$0xff]  ;;  %v427_v21 = vpop.permute.xlu1 %426 }
  0xb6   :  { %1006 = vst [vmem:[%s2726_s2 + $0x110] sm:$0xff] %v813_v39  ;;  %v791_v46 = vmul.f32 %v332_v43, %v119_v38  ;;  %v792_v48 = vmul.f32 %v332_v43, %v120_v42  ;;  %v72_v39 = vld [vmem:[%s2724_s0 + $0x1e8] sm:$0xff] }
  0xb7   :  { %1007 = vst.msk [vmem:[%s2726_s2 + $0x118] sm:$0xff] %vm972_vm0, %v814_v40  ;;  %v71_v40 = vld [vmem:[%s2724_s0 + $0x1e0] sm:$0xff]  ;;  %606 = vperm.xlu1 %1170, %v72_v39  }
  0xb8   :  { %986 = vst [vmem:[%s2726_s2 + $0x70] sm:$0xff] %v793_v44  ;;  %601 = vperm.xlu0 %1169, %v71_v40  }
  0xb9   :  { %987 = vst.msk [vmem:[%s2726_s2 + $0x78] sm:$0xff] %vm972_vm0, %v794_v45  ;;  %v447_v45 = vpop.permute.xlu2 %446 }
  0xbd   :  { %v442_v39 = vpop.permute.xlu1 %441 }
  0xc0   :  { %v147_v51 = vld [vmem:[%s2725_s1 + $0x140] sm:$0xff]  ;;  %v148_v52 = vld [vmem:[%s2725_s1 + $0x148] sm:$0xff] }
  0xc1   :  { %984 = vst [vmem:[%s2726_s2 + $0x60] sm:$0xff] %v791_v46  ;;  %v819_v57 = vmul.f32 %v402_v55, %v147_v51  ;;  %v820_v58 = vmul.f32 %v402_v55, %v148_v52  ;;  %v392_v51 = vpop.permute.xlu0 %391  ;;  %v76_v55 = vld [vmem:[%s2724_s0 + $0x208] sm:$0xff] }
  0xc2   :  { %626 = vperm.xlu2 %1171, %v76_v55  }
  0xc8   :  { %v127_v53 = vld [vmem:[%s2725_s1 + $0xa0] sm:$0xff]  ;;  %v128_v54 = vld [vmem:[%s2725_s1 + $0xa8] sm:$0xff] }
  0xc9   :  { %985 = vst.msk [vmem:[%s2726_s2 + $0x68] sm:$0xff] %vm972_vm0, %v792_v48  ;;  %v799_v62 = vmul.f32 %v352_v59, %v127_v53  ;;  %v800_v63 = vmul.f32 %v352_v59, %v128_v54 }
  0xd0   :  { %v125_v56 = vld [vmem:[%s2725_s1 + $0x90] sm:$0xff]  ;;  %v126_v60 = vld [vmem:[%s2725_s1 + $0x98] sm:$0xff] }
  0xd1   :  { %1012 = vst [vmem:[%s2726_s2 + $0x140] sm:$0xff] %v819_v57  ;;  %v797_v0 = vmul.f32 %v347_v61, %v125_v56  ;;  %v798_v2 = vmul.f32 %v347_v61, %v126_v60  ;;  %v75_v57 = vld [vmem:[%s2724_s0 + $0x200] sm:$0xff] }
  0xd2   :  { %1013 = vst.msk [vmem:[%s2726_s2 + $0x148] sm:$0xff] %vm972_vm0, %v820_v58  ;;  %v74_v58 = vld [vmem:[%s2724_s0 + $0x1f8] sm:$0xff]  ;;  %621 = vperm.xlu1 %1170, %v75_v57   ;;  %v457_v57 = vpop.permute.xlu1 %456 }
  0xd3   :  { %992 = vst [vmem:[%s2726_s2 + $0xa0] sm:$0xff] %v799_v62  ;;  %616 = vperm.xlu0 %1169, %v74_v58  }
  0xd4   :  { %993 = vst.msk [vmem:[%s2726_s2 + $0xa8] sm:$0xff] %vm972_vm0, %v800_v63  ;;  %v462_v63 = vpop.permute.xlu2 %461 }
  0xdb   :  { %v153_v5 = vld [vmem:[%s2725_s1 + $0x170] sm:$0xff]  ;;  %v154_v6 = vld [vmem:[%s2725_s1 + $0x178] sm:$0xff] }
  0xdc   :  { %990 = vst [vmem:[%s2726_s2 + $0x90] sm:$0xff] %v797_v0  ;;  %v825_v11 = vmul.f32 %v417_v9, %v153_v5  ;;  %v826_v12 = vmul.f32 %v417_v9, %v154_v6  ;;  %v407_v5 = vpop.permute.xlu0 %406  ;;  %v79_v9 = vld [vmem:[%s2724_s0 + $0x220] sm:$0xff] }
  0xdd   :  { %641 = vperm.xlu2 %1171, %v79_v9  }
  0xe3   :  { %v133_v7 = vld [vmem:[%s2725_s1 + $0xd0] sm:$0xff]  ;;  %v134_v8 = vld [vmem:[%s2725_s1 + $0xd8] sm:$0xff] }
  0xe4   :  { %991 = vst.msk [vmem:[%s2726_s2 + $0x98] sm:$0xff] %vm972_vm0, %v798_v2  ;;  %v805_v16 = vmul.f32 %v367_v13, %v133_v7  ;;  %v806_v17 = vmul.f32 %v367_v13, %v134_v8 }
  0xeb   :  { %v131_v10 = vld [vmem:[%s2725_s1 + $0xc0] sm:$0xff]  ;;  %v132_v14 = vld [vmem:[%s2725_s1 + $0xc8] sm:$0xff] }
  0xec   :  { %1018 = vst [vmem:[%s2726_s2 + $0x170] sm:$0xff] %v825_v11  ;;  %v803_v18 = vmul.f32 %v362_v15, %v131_v10  ;;  %v804_v20 = vmul.f32 %v362_v15, %v132_v14  ;;  %v78_v11 = vld [vmem:[%s2724_s0 + $0x218] sm:$0xff] }
  0xed   :  { %1019 = vst.msk [vmem:[%s2726_s2 + $0x178] sm:$0xff] %vm972_vm0, %v826_v12  ;;  %v77_v12 = vld [vmem:[%s2724_s0 + $0x210] sm:$0xff]  ;;  %636 = vperm.xlu1 %1170, %v78_v11   ;;  %v472_v11 = vpop.permute.xlu1 %471 }
  0xee   :  { %998 = vst [vmem:[%s2726_s2 + $0xd0] sm:$0xff] %v805_v16  ;;  %631 = vperm.xlu0 %1169, %v77_v12  }
  0xef   :  { %999 = vst.msk [vmem:[%s2726_s2 + $0xd8] sm:$0xff] %vm972_vm0, %v806_v17  ;;  %v477_v17 = vpop.permute.xlu2 %476 }
  0xf6   :  { %v159_v23 = vld [vmem:[%s2725_s1 + $0x1a0] sm:$0xff]  ;;  %v160_v24 = vld [vmem:[%s2725_s1 + $0x1a8] sm:$0xff] }
  0xf7   :  { %996 = vst [vmem:[%s2726_s2 + $0xc0] sm:$0xff] %v803_v18  ;;  %v831_v29 = vmul.f32 %v432_v27, %v159_v23  ;;  %v832_v30 = vmul.f32 %v432_v27, %v160_v24  ;;  %v422_v23 = vpop.permute.xlu0 %421  ;;  %v82_v27 = vld [vmem:[%s2724_s0 + $0x238] sm:$0xff] }
  0xf8   :  { %656 = vperm.xlu2 %1171, %v82_v27  }
  0xfe   :  { %v139_v25 = vld [vmem:[%s2725_s1 + $0x100] sm:$0xff]  ;;  %v140_v26 = vld [vmem:[%s2725_s1 + $0x108] sm:$0xff] }
  0xff   :  { %997 = vst.msk [vmem:[%s2726_s2 + $0xc8] sm:$0xff] %vm972_vm0, %v804_v20  ;;  %v811_v34 = vmul.f32 %v382_v31, %v139_v25  ;;  %v812_v35 = vmul.f32 %v382_v31, %v140_v26 }
 0x106   :  { %v137_v28 = vld [vmem:[%s2725_s1 + $0xf0] sm:$0xff]  ;;  %v138_v32 = vld [vmem:[%s2725_s1 + $0xf8] sm:$0xff] }
 0x107   :  { %1024 = vst [vmem:[%s2726_s2 + $0x1a0] sm:$0xff] %v831_v29  ;;  %v809_v36 = vmul.f32 %v377_v33, %v137_v28  ;;  %v810_v38 = vmul.f32 %v377_v33, %v138_v32  ;;  %v81_v29 = vld [vmem:[%s2724_s0 + $0x230] sm:$0xff] }
 0x108   :  { %1025 = vst.msk [vmem:[%s2726_s2 + $0x1a8] sm:$0xff] %vm972_vm0, %v832_v30  ;;  %v80_v30 = vld [vmem:[%s2724_s0 + $0x228] sm:$0xff]  ;;  %651 = vperm.xlu1 %1170, %v81_v29   ;;  %v487_v29 = vpop.permute.xlu1 %486 }
 0x109   :  { %1004 = vst [vmem:[%s2726_s2 + $0x100] sm:$0xff] %v811_v34  ;;  %646 = vperm.xlu0 %1169, %v80_v30  }
 0x10a   :  { %1005 = vst.msk [vmem:[%s2726_s2 + $0x108] sm:$0xff] %vm972_vm0, %v812_v35  ;;  %v492_v35 = vpop.permute.xlu2 %491 }
 0x111   :  { %v165_v41 = vld [vmem:[%s2725_s1 + $0x1d0] sm:$0xff]  ;;  %v166_v42 = vld [vmem:[%s2725_s1 + $0x1d8] sm:$0xff] }
 0x112   :  { %1002 = vst [vmem:[%s2726_s2 + $0xf0] sm:$0xff] %v809_v36  ;;  %v837_v47 = vmul.f32 %v447_v45, %v165_v41  ;;  %v838_v48 = vmul.f32 %v447_v45, %v166_v42  ;;  %v437_v41 = vpop.permute.xlu0 %436  ;;  %v85_v45 = vld [vmem:[%s2724_s0 + $0x250] sm:$0xff] }
 0x113   :  { %671 = vperm.xlu2 %1171, %v85_v45  }
 0x119   :  { %v145_v43 = vld [vmem:[%s2725_s1 + $0x130] sm:$0xff]  ;;  %v146_v44 = vld [vmem:[%s2725_s1 + $0x138] sm:$0xff] }
 0x11a   :  { %1003 = vst.msk [vmem:[%s2726_s2 + $0xf8] sm:$0xff] %vm972_vm0, %v810_v38  ;;  %v817_v52 = vmul.f32 %v397_v49, %v145_v43  ;;  %v818_v53 = vmul.f32 %v397_v49, %v146_v44 }
 0x121   :  { %v143_v46 = vld [vmem:[%s2725_s1 + $0x120] sm:$0xff]  ;;  %v144_v50 = vld [vmem:[%s2725_s1 + $0x128] sm:$0xff] }
 0x122   :  { %1030 = vst [vmem:[%s2726_s2 + $0x1d0] sm:$0xff] %v837_v47  ;;  %v815_v54 = vmul.f32 %v392_v51, %v143_v46  ;;  %v816_v56 = vmul.f32 %v392_v51, %v144_v50  ;;  %v84_v47 = vld [vmem:[%s2724_s0 + $0x248] sm:$0xff] }
 0x123   :  { %1031 = vst.msk [vmem:[%s2726_s2 + $0x1d8] sm:$0xff] %vm972_vm0, %v838_v48  ;;  %v83_v48 = vld [vmem:[%s2724_s0 + $0x240] sm:$0xff]  ;;  %666 = vperm.xlu1 %1170, %v84_v47   ;;  %v502_v47 = vpop.permute.xlu1 %501 }
 0x124   :  { %1010 = vst [vmem:[%s2726_s2 + $0x130] sm:$0xff] %v817_v52  ;;  %661 = vperm.xlu0 %1169, %v83_v48  }
 0x125   :  { %1011 = vst.msk [vmem:[%s2726_s2 + $0x138] sm:$0xff] %vm972_vm0, %v818_v53  ;;  %v507_v53 = vpop.permute.xlu2 %506 }
 0x12c   :  { %v171_v59 = vld [vmem:[%s2725_s1 + $0x200] sm:$0xff]  ;;  %v172_v60 = vld [vmem:[%s2725_s1 + $0x208] sm:$0xff] }
 0x12d   :  { %1008 = vst [vmem:[%s2726_s2 + $0x120] sm:$0xff] %v815_v54  ;;  %v843_v1 = vmul.f32 %v462_v63, %v171_v59  ;;  %v844_v2 = vmul.f32 %v462_v63, %v172_v60  ;;  %v452_v59 = vpop.permute.xlu0 %451  ;;  %v88_v63 = vld [vmem:[%s2724_s0 + $0x268] sm:$0xff] }
 0x12e   :  { %686 = vperm.xlu2 %1171, %v88_v63  }
 0x134   :  { %v151_v61 = vld [vmem:[%s2725_s1 + $0x160] sm:$0xff]  ;;  %v152_v62 = vld [vmem:[%s2725_s1 + $0x168] sm:$0xff] }
 0x135   :  { %1009 = vst.msk [vmem:[%s2726_s2 + $0x128] sm:$0xff] %vm972_vm0, %v816_v56  ;;  %v823_v6 = vmul.f32 %v412_v3, %v151_v61  ;;  %v824_v7 = vmul.f32 %v412_v3, %v152_v62 }
 0x13c   :  { %v149_v0 = vld [vmem:[%s2725_s1 + $0x150] sm:$0xff]  ;;  %v150_v4 = vld [vmem:[%s2725_s1 + $0x158] sm:$0xff] }
 0x13d   :  { %1036 = vst [vmem:[%s2726_s2 + $0x200] sm:$0xff] %v843_v1  ;;  %v821_v8 = vmul.f32 %v407_v5, %v149_v0  ;;  %v822_v10 = vmul.f32 %v407_v5, %v150_v4  ;;  %v87_v1 = vld [vmem:[%s2724_s0 + $0x260] sm:$0xff] }
 0x13e   :  { %1037 = vst.msk [vmem:[%s2726_s2 + $0x208] sm:$0xff] %vm972_vm0, %v844_v2  ;;  %v86_v2 = vld [vmem:[%s2724_s0 + $0x258] sm:$0xff]  ;;  %681 = vperm.xlu1 %1170, %v87_v1   ;;  %v517_v1 = vpop.permute.xlu1 %516 }
 0x13f   :  { %1016 = vst [vmem:[%s2726_s2 + $0x160] sm:$0xff] %v823_v6  ;;  %676 = vperm.xlu0 %1169, %v86_v2  }
 0x140   :  { %1017 = vst.msk [vmem:[%s2726_s2 + $0x168] sm:$0xff] %vm972_vm0, %v824_v7  ;;  %v522_v7 = vpop.permute.xlu2 %521 }
 0x147   :  { %v177_v13 = vld [vmem:[%s2725_s1 + $0x230] sm:$0xff]  ;;  %v178_v14 = vld [vmem:[%s2725_s1 + $0x238] sm:$0xff] }
 0x148   :  { %1014 = vst [vmem:[%s2726_s2 + $0x150] sm:$0xff] %v821_v8  ;;  %v849_v19 = vmul.f32 %v477_v17, %v177_v13  ;;  %v850_v20 = vmul.f32 %v477_v17, %v178_v14  ;;  %v467_v13 = vpop.permute.xlu0 %466  ;;  %v91_v17 = vld [vmem:[%s2724_s0 + $0x280] sm:$0xff] }
 0x149   :  { %701 = vperm.xlu2 %1171, %v91_v17  }
 0x14f   :  { %v157_v15 = vld [vmem:[%s2725_s1 + $0x190] sm:$0xff]  ;;  %v158_v16 = vld [vmem:[%s2725_s1 + $0x198] sm:$0xff] }
 0x150   :  { %1015 = vst.msk [vmem:[%s2726_s2 + $0x158] sm:$0xff] %vm972_vm0, %v822_v10  ;;  %v829_v24 = vmul.f32 %v427_v21, %v157_v15  ;;  %v830_v25 = vmul.f32 %v427_v21, %v158_v16 }
 0x157   :  { %v155_v18 = vld [vmem:[%s2725_s1 + $0x180] sm:$0xff]  ;;  %v156_v22 = vld [vmem:[%s2725_s1 + $0x188] sm:$0xff] }
 0x158   :  { %1042 = vst [vmem:[%s2726_s2 + $0x230] sm:$0xff] %v849_v19  ;;  %v827_v26 = vmul.f32 %v422_v23, %v155_v18  ;;  %v828_v28 = vmul.f32 %v422_v23, %v156_v22  ;;  %v90_v19 = vld [vmem:[%s2724_s0 + $0x278] sm:$0xff] }
 0x159   :  { %1043 = vst.msk [vmem:[%s2726_s2 + $0x238] sm:$0xff] %vm972_vm0, %v850_v20  ;;  %v89_v20 = vld [vmem:[%s2724_s0 + $0x270] sm:$0xff]  ;;  %696 = vperm.xlu1 %1170, %v90_v19   ;;  %v532_v19 = vpop.permute.xlu1 %531 }
 0x15a   :  { %1022 = vst [vmem:[%s2726_s2 + $0x190] sm:$0xff] %v829_v24  ;;  %691 = vperm.xlu0 %1169, %v89_v20  }
 0x15b   :  { %1023 = vst.msk [vmem:[%s2726_s2 + $0x198] sm:$0xff] %vm972_vm0, %v830_v25  ;;  %v537_v25 = vpop.permute.xlu2 %536 }
 0x162   :  { %v183_v31 = vld [vmem:[%s2725_s1 + $0x260] sm:$0xff]  ;;  %v184_v32 = vld [vmem:[%s2725_s1 + $0x268] sm:$0xff] }
 0x163   :  { %1020 = vst [vmem:[%s2726_s2 + $0x180] sm:$0xff] %v827_v26  ;;  %v855_v37 = vmul.f32 %v492_v35, %v183_v31  ;;  %v856_v38 = vmul.f32 %v492_v35, %v184_v32  ;;  %v482_v31 = vpop.permute.xlu0 %481  ;;  %v94_v35 = vld [vmem:[%s2724_s0 + $0x298] sm:$0xff] }
 0x164   :  { %716 = vperm.xlu2 %1171, %v94_v35  }
 0x16a   :  { %v163_v33 = vld [vmem:[%s2725_s1 + $0x1c0] sm:$0xff]  ;;  %v164_v34 = vld [vmem:[%s2725_s1 + $0x1c8] sm:$0xff] }
 0x16b   :  { %1021 = vst.msk [vmem:[%s2726_s2 + $0x188] sm:$0xff] %vm972_vm0, %v828_v28  ;;  %v835_v42 = vmul.f32 %v442_v39, %v163_v33  ;;  %v836_v43 = vmul.f32 %v442_v39, %v164_v34 }
 0x172   :  { %v161_v36 = vld [vmem:[%s2725_s1 + $0x1b0] sm:$0xff]  ;;  %v162_v40 = vld [vmem:[%s2725_s1 + $0x1b8] sm:$0xff] }
 0x173   :  { %1048 = vst [vmem:[%s2726_s2 + $0x260] sm:$0xff] %v855_v37  ;;  %v833_v44 = vmul.f32 %v437_v41, %v161_v36  ;;  %v834_v46 = vmul.f32 %v437_v41, %v162_v40  ;;  %v93_v37 = vld [vmem:[%s2724_s0 + $0x290] sm:$0xff] }
 0x174   :  { %1049 = vst.msk [vmem:[%s2726_s2 + $0x268] sm:$0xff] %vm972_vm0, %v856_v38  ;;  %v92_v38 = vld [vmem:[%s2724_s0 + $0x288] sm:$0xff]  ;;  %711 = vperm.xlu1 %1170, %v93_v37   ;;  %v547_v37 = vpop.permute.xlu1 %546 }
 0x175   :  { %1028 = vst [vmem:[%s2726_s2 + $0x1c0] sm:$0xff] %v835_v42  ;;  %706 = vperm.xlu0 %1169, %v92_v38  }
 0x176   :  { %1029 = vst.msk [vmem:[%s2726_s2 + $0x1c8] sm:$0xff] %vm972_vm0, %v836_v43  ;;  %v552_v43 = vpop.permute.xlu2 %551 }
 0x17d   :  { %v189_v49 = vld [vmem:[%s2725_s1 + $0x290] sm:$0xff]  ;;  %v190_v50 = vld [vmem:[%s2725_s1 + $0x298] sm:$0xff] }
 0x17e   :  { %1026 = vst [vmem:[%s2726_s2 + $0x1b0] sm:$0xff] %v833_v44  ;;  %v861_v55 = vmul.f32 %v507_v53, %v189_v49  ;;  %v862_v56 = vmul.f32 %v507_v53, %v190_v50  ;;  %v497_v49 = vpop.permute.xlu0 %496  ;;  %v97_v53 = vld [vmem:[%s2724_s0 + $0x2b0] sm:$0xff] }
 0x17f   :  { %731 = vperm.xlu2 %1171, %v97_v53  }
 0x185   :  { %v169_v51 = vld [vmem:[%s2725_s1 + $0x1f0] sm:$0xff]  ;;  %v170_v52 = vld [vmem:[%s2725_s1 + $0x1f8] sm:$0xff] }
 0x186   :  { %1027 = vst.msk [vmem:[%s2726_s2 + $0x1b8] sm:$0xff] %vm972_vm0, %v834_v46  ;;  %v841_v60 = vmul.f32 %v457_v57, %v169_v51  ;;  %v842_v61 = vmul.f32 %v457_v57, %v170_v52 }
 0x18d   :  { %v167_v54 = vld [vmem:[%s2725_s1 + $0x1e0] sm:$0xff]  ;;  %v168_v58 = vld [vmem:[%s2725_s1 + $0x1e8] sm:$0xff] }
 0x18e   :  { %1054 = vst [vmem:[%s2726_s2 + $0x290] sm:$0xff] %v861_v55  ;;  %v839_v62 = vmul.f32 %v452_v59, %v167_v54  ;;  %v840_v0 = vmul.f32 %v452_v59, %v168_v58  ;;  %v96_v55 = vld [vmem:[%s2724_s0 + $0x2a8] sm:$0xff] }
 0x18f   :  { %1055 = vst.msk [vmem:[%s2726_s2 + $0x298] sm:$0xff] %vm972_vm0, %v862_v56  ;;  %v95_v56 = vld [vmem:[%s2724_s0 + $0x2a0] sm:$0xff]  ;;  %726 = vperm.xlu1 %1170, %v96_v55   ;;  %v562_v55 = vpop.permute.xlu1 %561 }
 0x190   :  { %1034 = vst [vmem:[%s2726_s2 + $0x1f0] sm:$0xff] %v841_v60  ;;  %721 = vperm.xlu0 %1169, %v95_v56  }
 0x191   :  { %1035 = vst.msk [vmem:[%s2726_s2 + $0x1f8] sm:$0xff] %vm972_vm0, %v842_v61  ;;  %v567_v61 = vpop.permute.xlu2 %566 }
 0x198   :  { %v195_v3 = vld [vmem:[%s2725_s1 + $0x2c0] sm:$0xff]  ;;  %v196_v4 = vld [vmem:[%s2725_s1 + $0x2c8] sm:$0xff] }
 0x199   :  { %1032 = vst [vmem:[%s2726_s2 + $0x1e0] sm:$0xff] %v839_v62  ;;  %v867_v9 = vmul.f32 %v522_v7, %v195_v3  ;;  %v868_v10 = vmul.f32 %v522_v7, %v196_v4  ;;  %v512_v3 = vpop.permute.xlu0 %511  ;;  %v100_v7 = vld [vmem:[%s2724_s0 + $0x2c8] sm:$0xff] }
 0x19a   :  { %746 = vperm.xlu2 %1171, %v100_v7  }
 0x1a0   :  { %v175_v5 = vld [vmem:[%s2725_s1 + $0x220] sm:$0xff]  ;;  %v176_v6 = vld [vmem:[%s2725_s1 + $0x228] sm:$0xff] }
 0x1a1   :  { %1033 = vst.msk [vmem:[%s2726_s2 + $0x1e8] sm:$0xff] %vm972_vm0, %v840_v0  ;;  %v847_v14 = vmul.f32 %v472_v11, %v175_v5  ;;  %v848_v15 = vmul.f32 %v472_v11, %v176_v6 }
 0x1a8   :  { %v173_v8 = vld [vmem:[%s2725_s1 + $0x210] sm:$0xff]  ;;  %v174_v12 = vld [vmem:[%s2725_s1 + $0x218] sm:$0xff] }
 0x1a9   :  { %1060 = vst [vmem:[%s2726_s2 + $0x2c0] sm:$0xff] %v867_v9  ;;  %v845_v16 = vmul.f32 %v467_v13, %v173_v8  ;;  %v846_v18 = vmul.f32 %v467_v13, %v174_v12  ;;  %v99_v9 = vld [vmem:[%s2724_s0 + $0x2c0] sm:$0xff] }
 0x1aa   :  { %1061 = vst.msk [vmem:[%s2726_s2 + $0x2c8] sm:$0xff] %vm972_vm0, %v868_v10  ;;  %v98_v10 = vld [vmem:[%s2724_s0 + $0x2b8] sm:$0xff]  ;;  %741 = vperm.xlu1 %1170, %v99_v9  }
 0x1ab   :  { %1040 = vst [vmem:[%s2726_s2 + $0x220] sm:$0xff] %v847_v14  ;;  %736 = vperm.xlu0 %1169, %v98_v10  }
 0x1ac   :  { %1041 = vst.msk [vmem:[%s2726_s2 + $0x228] sm:$0xff] %vm972_vm0, %v848_v15  ;;  %v582_v15 = vpop.permute.xlu2 %581 }
 0x1b3   :  { %v201_v21 = vld [vmem:[%s2725_s1 + $0x2f0] sm:$0xff]  ;;  %v202_v22 = vld [vmem:[%s2725_s1 + $0x2f8] sm:$0xff] }
 0x1b4   :  { %1038 = vst [vmem:[%s2726_s2 + $0x210] sm:$0xff] %v845_v16  ;;  %v873_v27 = vmul.f32 %v537_v25, %v201_v21  ;;  %v874_v28 = vmul.f32 %v537_v25, %v202_v22  ;;  %v527_v21 = vpop.permute.xlu0 %526  ;;  %v103_v25 = vld [vmem:[%s2724_s0 + $0x2e0] sm:$0xff] }
 0x1b5   :  { %761 = vperm.xlu2 %1171, %v103_v25  }
 0x1bb   :  { %v181_v23 = vld [vmem:[%s2725_s1 + $0x250] sm:$0xff]  ;;  %v182_v24 = vld [vmem:[%s2725_s1 + $0x258] sm:$0xff] }
 0x1bc   :  { %1039 = vst.msk [vmem:[%s2726_s2 + $0x218] sm:$0xff] %vm972_vm0, %v846_v18  ;;  %v853_v32 = vmul.f32 %v487_v29, %v181_v23  ;;  %v854_v33 = vmul.f32 %v487_v29, %v182_v24 }
 0x1c3   :  { %v179_v26 = vld [vmem:[%s2725_s1 + $0x240] sm:$0xff]  ;;  %v180_v30 = vld [vmem:[%s2725_s1 + $0x248] sm:$0xff] }
 0x1c4   :  { %1066 = vst [vmem:[%s2726_s2 + $0x2f0] sm:$0xff] %v873_v27  ;;  %v851_v34 = vmul.f32 %v482_v31, %v179_v26  ;;  %v852_v36 = vmul.f32 %v482_v31, %v180_v30  ;;  %v102_v27 = vld [vmem:[%s2724_s0 + $0x2d8] sm:$0xff] }
 0x1c5   :  { %1067 = vst.msk [vmem:[%s2726_s2 + $0x2f8] sm:$0xff] %vm972_vm0, %v874_v28  ;;  %v101_v28 = vld [vmem:[%s2724_s0 + $0x2d0] sm:$0xff]  ;;  %756 = vperm.xlu1 %1170, %v102_v27  }
 0x1c6   :  { %1046 = vst [vmem:[%s2726_s2 + $0x250] sm:$0xff] %v853_v32  ;;  %751 = vperm.xlu0 %1169, %v101_v28  }
 0x1c7   :  { %1047 = vst.msk [vmem:[%s2726_s2 + $0x258] sm:$0xff] %vm972_vm0, %v854_v33  ;;  %v597_v33 = vpop.permute.xlu2 %596 }
 0x1ce   :  { %v207_v39 = vld [vmem:[%s2725_s1 + $0x320] sm:$0xff]  ;;  %v208_v40 = vld [vmem:[%s2725_s1 + $0x328] sm:$0xff] }
 0x1cf   :  { %1044 = vst [vmem:[%s2726_s2 + $0x240] sm:$0xff] %v851_v34  ;;  %v879_v45 = vmul.f32 %v552_v43, %v207_v39  ;;  %v880_v46 = vmul.f32 %v552_v43, %v208_v40  ;;  %v542_v39 = vpop.permute.xlu0 %541  ;;  %v106_v43 = vld [vmem:[%s2724_s0 + $0x2f8] sm:$0xff] }
 0x1d0   :  { %776 = vperm.xlu2 %1171, %v106_v43  }
 0x1d6   :  { %v187_v41 = vld [vmem:[%s2725_s1 + $0x280] sm:$0xff]  ;;  %v188_v42 = vld [vmem:[%s2725_s1 + $0x288] sm:$0xff] }
 0x1d7   :  { %1045 = vst.msk [vmem:[%s2726_s2 + $0x248] sm:$0xff] %vm972_vm0, %v852_v36  ;;  %v859_v50 = vmul.f32 %v502_v47, %v187_v41  ;;  %v860_v51 = vmul.f32 %v502_v47, %v188_v42 }
 0x1de   :  { %v185_v44 = vld [vmem:[%s2725_s1 + $0x270] sm:$0xff]  ;;  %v186_v48 = vld [vmem:[%s2725_s1 + $0x278] sm:$0xff] }
 0x1df   :  { %1072 = vst [vmem:[%s2726_s2 + $0x320] sm:$0xff] %v879_v45  ;;  %v857_v52 = vmul.f32 %v497_v49, %v185_v44  ;;  %v858_v54 = vmul.f32 %v497_v49, %v186_v48  ;;  %v105_v45 = vld [vmem:[%s2724_s0 + $0x2f0] sm:$0xff] }
 0x1e0   :  { %1073 = vst.msk [vmem:[%s2726_s2 + $0x328] sm:$0xff] %vm972_vm0, %v880_v46  ;;  %v104_v46 = vld [vmem:[%s2724_s0 + $0x2e8] sm:$0xff]  ;;  %771 = vperm.xlu1 %1170, %v105_v45  }
 0x1e1   :  { %1052 = vst [vmem:[%s2726_s2 + $0x280] sm:$0xff] %v859_v50  ;;  %766 = vperm.xlu0 %1169, %v104_v46  }
 0x1e2   :  { %1053 = vst.msk [vmem:[%s2726_s2 + $0x288] sm:$0xff] %vm972_vm0, %v860_v51  ;;  %v612_v51 = vpop.permute.xlu2 %611 }
 0x1e9   :  { %v213_v57 = vld [vmem:[%s2725_s1 + $0x350] sm:$0xff]  ;;  %v214_v58 = vld [vmem:[%s2725_s1 + $0x358] sm:$0xff] }
 0x1ea   :  { %1050 = vst [vmem:[%s2726_s2 + $0x270] sm:$0xff] %v857_v52  ;;  %v885_v63 = vmul.f32 %v567_v61, %v213_v57  ;;  %v886_v0 = vmul.f32 %v567_v61, %v214_v58  ;;  %v557_v57 = vpop.permute.xlu0 %556 }
 0x1f1   :  { %v193_v59 = vld [vmem:[%s2725_s1 + $0x2b0] sm:$0xff]  ;;  %v194_v60 = vld [vmem:[%s2725_s1 + $0x2b8] sm:$0xff] }
 0x1f2   :  { %1051 = vst.msk [vmem:[%s2726_s2 + $0x278] sm:$0xff] %vm972_vm0, %v858_v54  ;;  %v865_v4 = vmul.f32 %v517_v1, %v193_v59  ;;  %v866_v5 = vmul.f32 %v517_v1, %v194_v60 }
 0x1f9   :  { %v191_v62 = vld [vmem:[%s2725_s1 + $0x2a0] sm:$0xff]  ;;  %v192_v2 = vld [vmem:[%s2725_s1 + $0x2a8] sm:$0xff] }
 0x1fa   :  { %1078 = vst [vmem:[%s2726_s2 + $0x350] sm:$0xff] %v885_v63  ;;  %v863_v6 = vmul.f32 %v512_v3, %v191_v62  ;;  %v864_v8 = vmul.f32 %v512_v3, %v192_v2  ;;  %v627_v2 = vpop.permute.xlu2 %626 }
 0x1fb   :  { %1079 = vst.msk [vmem:[%s2726_s2 + $0x358] sm:$0xff] %vm972_vm0, %v886_v0 }
 0x1fc   :  { %1058 = vst [vmem:[%s2726_s2 + $0x2b0] sm:$0xff] %v865_v4 }
 0x1fd   :  { %1059 = vst.msk [vmem:[%s2726_s2 + $0x2b8] sm:$0xff] %vm972_vm0, %v866_v5 }
 0x204   :  { %v219_v11 = vld [vmem:[%s2725_s1 + $0x380] sm:$0xff]  ;;  %v220_v12 = vld [vmem:[%s2725_s1 + $0x388] sm:$0xff] }
 0x205   :  { %1056 = vst [vmem:[%s2726_s2 + $0x2a0] sm:$0xff] %v863_v6  ;;  %v891_v17 = vmul.f32 %v582_v15, %v219_v11  ;;  %v892_v18 = vmul.f32 %v582_v15, %v220_v12  ;;  %v577_v6 = vpop.permute.xlu1 %576 }
 0x20c   :  { %v199_v13 = vld [vmem:[%s2725_s1 + $0x2e0] sm:$0xff]  ;;  %v200_v14 = vld [vmem:[%s2725_s1 + $0x2e8] sm:$0xff] }
 0x20d   :  { %1057 = vst.msk [vmem:[%s2726_s2 + $0x2a8] sm:$0xff] %vm972_vm0, %v864_v8  ;;  %v871_v22 = vmul.f32 %v532_v19, %v199_v13  ;;  %v872_v23 = vmul.f32 %v532_v19, %v200_v14  ;;  %v572_v8 = vpop.permute.xlu0 %571 }
 0x214   :  { %v197_v16 = vld [vmem:[%s2725_s1 + $0x2d0] sm:$0xff]  ;;  %v198_v20 = vld [vmem:[%s2725_s1 + $0x2d8] sm:$0xff] }
 0x215   :  { %1084 = vst [vmem:[%s2726_s2 + $0x380] sm:$0xff] %v891_v17  ;;  %v869_v24 = vmul.f32 %v527_v21, %v197_v16  ;;  %v870_v26 = vmul.f32 %v527_v21, %v198_v20  ;;  %v642_v17 = vpop.permute.xlu2 %641  ;;  %v592_v21 = vpop.permute.xlu1 %591 }
 0x216   :  { %1085 = vst.msk [vmem:[%s2726_s2 + $0x388] sm:$0xff] %vm972_vm0, %v892_v18 }
 0x217   :  { %1064 = vst [vmem:[%s2726_s2 + $0x2e0] sm:$0xff] %v871_v22 }
 0x218   :  { %1065 = vst.msk [vmem:[%s2726_s2 + $0x2e8] sm:$0xff] %vm972_vm0, %v872_v23  ;;  %v587_v23 = vpop.permute.xlu0 %586 }
 0x21f   :  { %v225_v29 = vld [vmem:[%s2725_s1 + $0x3b0] sm:$0xff]  ;;  %v226_v30 = vld [vmem:[%s2725_s1 + $0x3b8] sm:$0xff] }
 0x220   :  { %1062 = vst [vmem:[%s2726_s2 + $0x2d0] sm:$0xff] %v869_v24  ;;  %v897_v35 = vmul.f32 %v597_v33, %v225_v29  ;;  %v898_v36 = vmul.f32 %v597_v33, %v226_v30 }
 0x227   :  { %v205_v31 = vld [vmem:[%s2725_s1 + $0x310] sm:$0xff]  ;;  %v206_v32 = vld [vmem:[%s2725_s1 + $0x318] sm:$0xff] }
 0x228   :  { %1063 = vst.msk [vmem:[%s2726_s2 + $0x2d8] sm:$0xff] %vm972_vm0, %v870_v26  ;;  %v877_v40 = vmul.f32 %v547_v37, %v205_v31  ;;  %v878_v41 = vmul.f32 %v547_v37, %v206_v32  ;;  %v657_v32 = vpop.permute.xlu2 %656 }
 0x22f   :  { %v203_v34 = vld [vmem:[%s2725_s1 + $0x300] sm:$0xff]  ;;  %v204_v38 = vld [vmem:[%s2725_s1 + $0x308] sm:$0xff] }
 0x230   :  { %1090 = vst [vmem:[%s2726_s2 + $0x3b0] sm:$0xff] %v897_v35  ;;  %v875_v42 = vmul.f32 %v542_v39, %v203_v34  ;;  %v876_v44 = vmul.f32 %v542_v39, %v204_v38  ;;  %v602_v38 = vpop.permute.xlu0 %601 }
 0x231   :  { %1091 = vst.msk [vmem:[%s2726_s2 + $0x3b8] sm:$0xff] %vm972_vm0, %v898_v36  ;;  %v607_v36 = vpop.permute.xlu1 %606 }
 0x232   :  { %1070 = vst [vmem:[%s2726_s2 + $0x310] sm:$0xff] %v877_v40 }
 0x233   :  { %1071 = vst.msk [vmem:[%s2726_s2 + $0x318] sm:$0xff] %vm972_vm0, %v878_v41 }
 0x23a   :  { %v231_v47 = vld [vmem:[%s2725_s1 + $0x3e0] sm:$0xff]  ;;  %v232_v48 = vld [vmem:[%s2725_s1 + $0x3e8] sm:$0xff] }
 0x23b   :  { %1068 = vst [vmem:[%s2726_s2 + $0x300] sm:$0xff] %v875_v42  ;;  %v903_v53 = vmul.f32 %v612_v51, %v231_v47  ;;  %v904_v54 = vmul.f32 %v612_v51, %v232_v48  ;;  %v672_v47 = vpop.permute.xlu2 %671  ;;  %v622_v51 = vpop.permute.xlu1 %621 }
 0x242   :  { %v211_v49 = vld [vmem:[%s2725_s1 + $0x340] sm:$0xff]  ;;  %v212_v50 = vld [vmem:[%s2725_s1 + $0x348] sm:$0xff] }
 0x243   :  { %1069 = vst.msk [vmem:[%s2726_s2 + $0x308] sm:$0xff] %vm972_vm0, %v876_v44  ;;  %v883_v58 = vmul.f32 %v562_v55, %v211_v49  ;;  %v884_v59 = vmul.f32 %v562_v55, %v212_v50 }
 0x24a   :  { %v209_v52 = vld [vmem:[%s2725_s1 + $0x330] sm:$0xff]  ;;  %v210_v56 = vld [vmem:[%s2725_s1 + $0x338] sm:$0xff] }
 0x24b   :  { %1096 = vst [vmem:[%s2726_s2 + $0x3e0] sm:$0xff] %v903_v53  ;;  %v881_v60 = vmul.f32 %v557_v57, %v209_v52  ;;  %v882_v61 = vmul.f32 %v557_v57, %v210_v56  ;;  %v617_v53 = vpop.permute.xlu0 %616 }
 0x24c   :  { %1097 = vst.msk [vmem:[%s2726_s2 + $0x3e8] sm:$0xff] %vm972_vm0, %v904_v54 }
 0x24d   :  { %1076 = vst [vmem:[%s2726_s2 + $0x340] sm:$0xff] %v883_v58 }
 0x24e   :  { %1077 = vst.msk [vmem:[%s2726_s2 + $0x348] sm:$0xff] %vm972_vm0, %v884_v59 }
 0x255   :  { %v237_v62 = vld [vmem:[%s2725_s1 + $0x410] sm:$0xff]  ;;  %v238_v63 = vld [vmem:[%s2725_s1 + $0x418] sm:$0xff] }
 0x256   :  { %1074 = vst [vmem:[%s2726_s2 + $0x330] sm:$0xff] %v881_v60  ;;  %v909_v4 = vmul.f32 %v627_v2, %v237_v62  ;;  %v910_v5 = vmul.f32 %v627_v2, %v238_v63  ;;  %v687_v62 = vpop.permute.xlu2 %686  ;;  %v637_v2 = vpop.permute.xlu1 %636 }
 0x25d   :  { %v217_v0 = vld [vmem:[%s2725_s1 + $0x370] sm:$0xff]  ;;  %v218_v1 = vld [vmem:[%s2725_s1 + $0x378] sm:$0xff] }
 0x25e   :  { %1075 = vst.msk [vmem:[%s2726_s2 + $0x338] sm:$0xff] %vm972_vm0, %v882_v61  ;;  %v889_v9 = vmul.f32 %v577_v6, %v217_v0  ;;  %v890_v10 = vmul.f32 %v577_v6, %v218_v1 }
 0x265   :  { %v215_v3 = vld [vmem:[%s2725_s1 + $0x360] sm:$0xff]  ;;  %v216_v7 = vld [vmem:[%s2725_s1 + $0x368] sm:$0xff] }
 0x266   :  { %1102 = vst [vmem:[%s2726_s2 + $0x410] sm:$0xff] %v909_v4  ;;  %v887_v11 = vmul.f32 %v572_v8, %v215_v3  ;;  %v888_v12 = vmul.f32 %v572_v8, %v216_v7  ;;  %v632_v4 = vpop.permute.xlu0 %631 }
 0x267   :  { %1103 = vst.msk [vmem:[%s2726_s2 + $0x418] sm:$0xff] %vm972_vm0, %v910_v5 }
 0x268   :  { %1082 = vst [vmem:[%s2726_s2 + $0x370] sm:$0xff] %v889_v9 }
 0x269   :  { %1083 = vst.msk [vmem:[%s2726_s2 + $0x378] sm:$0xff] %vm972_vm0, %v890_v10 }
 0x270   :  { %v243_v13 = vld [vmem:[%s2725_s1 + $0x440] sm:$0xff]  ;;  %v244_v14 = vld [vmem:[%s2725_s1 + $0x448] sm:$0xff] }
 0x271   :  { %1080 = vst [vmem:[%s2726_s2 + $0x360] sm:$0xff] %v887_v11  ;;  %v915_v19 = vmul.f32 %v642_v17, %v243_v13  ;;  %v916_v20 = vmul.f32 %v642_v17, %v244_v14  ;;  %v702_v13 = vpop.permute.xlu2 %701  ;;  %v652_v17 = vpop.permute.xlu1 %651 }
 0x278   :  { %v223_v15 = vld [vmem:[%s2725_s1 + $0x3a0] sm:$0xff]  ;;  %v224_v16 = vld [vmem:[%s2725_s1 + $0x3a8] sm:$0xff] }
 0x279   :  { %1081 = vst.msk [vmem:[%s2726_s2 + $0x368] sm:$0xff] %vm972_vm0, %v888_v12  ;;  %v895_v24 = vmul.f32 %v592_v21, %v223_v15  ;;  %v896_v25 = vmul.f32 %v592_v21, %v224_v16 }
 0x280   :  { %v221_v18 = vld [vmem:[%s2725_s1 + $0x390] sm:$0xff]  ;;  %v222_v22 = vld [vmem:[%s2725_s1 + $0x398] sm:$0xff] }
 0x281   :  { %1108 = vst [vmem:[%s2726_s2 + $0x440] sm:$0xff] %v915_v19  ;;  %v893_v26 = vmul.f32 %v587_v23, %v221_v18  ;;  %v894_v27 = vmul.f32 %v587_v23, %v222_v22  ;;  %v647_v19 = vpop.permute.xlu0 %646 }
 0x282   :  { %1109 = vst.msk [vmem:[%s2726_s2 + $0x448] sm:$0xff] %vm972_vm0, %v916_v20 }
 0x283   :  { %1088 = vst [vmem:[%s2726_s2 + $0x3a0] sm:$0xff] %v895_v24 }
 0x284   :  { %1089 = vst.msk [vmem:[%s2726_s2 + $0x3a8] sm:$0xff] %vm972_vm0, %v896_v25 }
 0x28b   :  { %v249_v28 = vld [vmem:[%s2725_s1 + $0x470] sm:$0xff]  ;;  %v250_v29 = vld [vmem:[%s2725_s1 + $0x478] sm:$0xff] }
 0x28c   :  { %1086 = vst [vmem:[%s2726_s2 + $0x390] sm:$0xff] %v893_v26  ;;  %v921_v34 = vmul.f32 %v657_v32, %v249_v28  ;;  %v922_v35 = vmul.f32 %v657_v32, %v250_v29  ;;  %v717_v28 = vpop.permute.xlu2 %716  ;;  %v667_v32 = vpop.permute.xlu1 %666 }
 0x293   :  { %v229_v30 = vld [vmem:[%s2725_s1 + $0x3d0] sm:$0xff]  ;;  %v230_v31 = vld [vmem:[%s2725_s1 + $0x3d8] sm:$0xff] }
 0x294   :  { %1087 = vst.msk [vmem:[%s2726_s2 + $0x398] sm:$0xff] %vm972_vm0, %v894_v27  ;;  %v901_v39 = vmul.f32 %v607_v36, %v229_v30  ;;  %v902_v40 = vmul.f32 %v607_v36, %v230_v31 }
 0x29b   :  { %v227_v33 = vld [vmem:[%s2725_s1 + $0x3c0] sm:$0xff]  ;;  %v228_v37 = vld [vmem:[%s2725_s1 + $0x3c8] sm:$0xff] }
 0x29c   :  { %1114 = vst [vmem:[%s2726_s2 + $0x470] sm:$0xff] %v921_v34  ;;  %v899_v41 = vmul.f32 %v602_v38, %v227_v33  ;;  %v900_v42 = vmul.f32 %v602_v38, %v228_v37  ;;  %v662_v34 = vpop.permute.xlu0 %661 }
 0x29d   :  { %1115 = vst.msk [vmem:[%s2726_s2 + $0x478] sm:$0xff] %vm972_vm0, %v922_v35 }
 0x29e   :  { %1094 = vst [vmem:[%s2726_s2 + $0x3d0] sm:$0xff] %v901_v39 }
 0x29f   :  { %1095 = vst.msk [vmem:[%s2726_s2 + $0x3d8] sm:$0xff] %vm972_vm0, %v902_v40 }
 0x2a6   :  { %v255_v43 = vld [vmem:[%s2725_s1 + $0x4a0] sm:$0xff]  ;;  %v256_v44 = vld [vmem:[%s2725_s1 + $0x4a8] sm:$0xff] }
 0x2a7   :  { %1092 = vst [vmem:[%s2726_s2 + $0x3c0] sm:$0xff] %v899_v41  ;;  %v927_v49 = vmul.f32 %v672_v47, %v255_v43  ;;  %v928_v50 = vmul.f32 %v672_v47, %v256_v44  ;;  %v732_v43 = vpop.permute.xlu2 %731  ;;  %v682_v47 = vpop.permute.xlu1 %681 }
 0x2ae   :  { %v235_v45 = vld [vmem:[%s2725_s1 + $0x400] sm:$0xff]  ;;  %v236_v46 = vld [vmem:[%s2725_s1 + $0x408] sm:$0xff] }
 0x2af   :  { %1093 = vst.msk [vmem:[%s2726_s2 + $0x3c8] sm:$0xff] %vm972_vm0, %v900_v42  ;;  %v907_v54 = vmul.f32 %v622_v51, %v235_v45  ;;  %v908_v55 = vmul.f32 %v622_v51, %v236_v46 }
 0x2b6   :  { %v233_v48 = vld [vmem:[%s2725_s1 + $0x3f0] sm:$0xff]  ;;  %v234_v52 = vld [vmem:[%s2725_s1 + $0x3f8] sm:$0xff] }
 0x2b7   :  { %1120 = vst [vmem:[%s2726_s2 + $0x4a0] sm:$0xff] %v927_v49  ;;  %v905_v56 = vmul.f32 %v617_v53, %v233_v48  ;;  %v906_v57 = vmul.f32 %v617_v53, %v234_v52  ;;  %v677_v49 = vpop.permute.xlu0 %676 }
 0x2b8   :  { %1121 = vst.msk [vmem:[%s2726_s2 + $0x4a8] sm:$0xff] %vm972_vm0, %v928_v50 }
 0x2b9   :  { %1100 = vst [vmem:[%s2726_s2 + $0x400] sm:$0xff] %v907_v54 }
 0x2ba   :  { %1101 = vst.msk [vmem:[%s2726_s2 + $0x408] sm:$0xff] %vm972_vm0, %v908_v55 }
 0x2c1   :  { %v261_v58 = vld [vmem:[%s2725_s1 + $0x4d0] sm:$0xff]  ;;  %v262_v59 = vld [vmem:[%s2725_s1 + $0x4d8] sm:$0xff] }
 0x2c2   :  { %1098 = vst [vmem:[%s2726_s2 + $0x3f0] sm:$0xff] %v905_v56  ;;  %v933_v0 = vmul.f32 %v687_v62, %v261_v58  ;;  %v934_v1 = vmul.f32 %v687_v62, %v262_v59  ;;  %v747_v58 = vpop.permute.xlu2 %746  ;;  %v697_v62 = vpop.permute.xlu1 %696 }
 0x2c9   :  { %v241_v60 = vld [vmem:[%s2725_s1 + $0x430] sm:$0xff]  ;;  %v242_v61 = vld [vmem:[%s2725_s1 + $0x438] sm:$0xff] }
 0x2ca   :  { %1099 = vst.msk [vmem:[%s2726_s2 + $0x3f8] sm:$0xff] %vm972_vm0, %v906_v57  ;;  %v913_v5 = vmul.f32 %v637_v2, %v241_v60  ;;  %v914_v6 = vmul.f32 %v637_v2, %v242_v61 }
 0x2d1   :  { %v239_v63 = vld [vmem:[%s2725_s1 + $0x420] sm:$0xff]  ;;  %v240_v3 = vld [vmem:[%s2725_s1 + $0x428] sm:$0xff] }
 0x2d2   :  { %1126 = vst [vmem:[%s2726_s2 + $0x4d0] sm:$0xff] %v933_v0  ;;  %v911_v7 = vmul.f32 %v632_v4, %v239_v63  ;;  %v912_v8 = vmul.f32 %v632_v4, %v240_v3  ;;  %v692_v0 = vpop.permute.xlu0 %691 }
 0x2d3   :  { %1127 = vst.msk [vmem:[%s2726_s2 + $0x4d8] sm:$0xff] %vm972_vm0, %v934_v1 }
 0x2d4   :  { %1106 = vst [vmem:[%s2726_s2 + $0x430] sm:$0xff] %v913_v5 }
 0x2d5   :  { %1107 = vst.msk [vmem:[%s2726_s2 + $0x438] sm:$0xff] %vm972_vm0, %v914_v6 }
 0x2dc   :  { %v267_v9 = vld [vmem:[%s2725_s1 + $0x500] sm:$0xff]  ;;  %v268_v10 = vld [vmem:[%s2725_s1 + $0x508] sm:$0xff] }
 0x2dd   :  { %1104 = vst [vmem:[%s2726_s2 + $0x420] sm:$0xff] %v911_v7  ;;  %v939_v15 = vmul.f32 %v702_v13, %v267_v9  ;;  %v940_v16 = vmul.f32 %v702_v13, %v268_v10  ;;  %v762_v9 = vpop.permute.xlu2 %761  ;;  %v712_v13 = vpop.permute.xlu1 %711 }
 0x2e4   :  { %v247_v11 = vld [vmem:[%s2725_s1 + $0x460] sm:$0xff]  ;;  %v248_v12 = vld [vmem:[%s2725_s1 + $0x468] sm:$0xff] }
 0x2e5   :  { %1105 = vst.msk [vmem:[%s2726_s2 + $0x428] sm:$0xff] %vm972_vm0, %v912_v8  ;;  %v919_v20 = vmul.f32 %v652_v17, %v247_v11  ;;  %v920_v21 = vmul.f32 %v652_v17, %v248_v12 }
 0x2ec   :  { %v245_v14 = vld [vmem:[%s2725_s1 + $0x450] sm:$0xff]  ;;  %v246_v18 = vld [vmem:[%s2725_s1 + $0x458] sm:$0xff] }
 0x2ed   :  { %1132 = vst [vmem:[%s2726_s2 + $0x500] sm:$0xff] %v939_v15  ;;  %v917_v22 = vmul.f32 %v647_v19, %v245_v14  ;;  %v918_v23 = vmul.f32 %v647_v19, %v246_v18  ;;  %v707_v15 = vpop.permute.xlu0 %706 }
 0x2ee   :  { %1133 = vst.msk [vmem:[%s2726_s2 + $0x508] sm:$0xff] %vm972_vm0, %v940_v16 }
 0x2ef   :  { %1112 = vst [vmem:[%s2726_s2 + $0x460] sm:$0xff] %v919_v20 }
 0x2f0   :  { %1113 = vst.msk [vmem:[%s2726_s2 + $0x468] sm:$0xff] %vm972_vm0, %v920_v21 }
 0x2f7   :  { %v273_v24 = vld [vmem:[%s2725_s1 + $0x530] sm:$0xff]  ;;  %v274_v25 = vld [vmem:[%s2725_s1 + $0x538] sm:$0xff] }
 0x2f8   :  { %1110 = vst [vmem:[%s2726_s2 + $0x450] sm:$0xff] %v917_v22  ;;  %v945_v30 = vmul.f32 %v717_v28, %v273_v24  ;;  %v946_v31 = vmul.f32 %v717_v28, %v274_v25  ;;  %v777_v24 = vpop.permute.xlu2 %776  ;;  %v727_v28 = vpop.permute.xlu1 %726 }
 0x2ff   :  { %v253_v26 = vld [vmem:[%s2725_s1 + $0x490] sm:$0xff]  ;;  %v254_v27 = vld [vmem:[%s2725_s1 + $0x498] sm:$0xff] }
 0x300   :  { %1111 = vst.msk [vmem:[%s2726_s2 + $0x458] sm:$0xff] %vm972_vm0, %v918_v23  ;;  %v925_v35 = vmul.f32 %v667_v32, %v253_v26  ;;  %v926_v36 = vmul.f32 %v667_v32, %v254_v27 }
 0x307   :  { %v251_v29 = vld [vmem:[%s2725_s1 + $0x480] sm:$0xff]  ;;  %v252_v33 = vld [vmem:[%s2725_s1 + $0x488] sm:$0xff] }
 0x308   :  { %1138 = vst [vmem:[%s2726_s2 + $0x530] sm:$0xff] %v945_v30  ;;  %v923_v37 = vmul.f32 %v662_v34, %v251_v29  ;;  %v924_v38 = vmul.f32 %v662_v34, %v252_v33  ;;  %v722_v30 = vpop.permute.xlu0 %721 }
 0x309   :  { %1139 = vst.msk [vmem:[%s2726_s2 + $0x538] sm:$0xff] %vm972_vm0, %v946_v31 }
 0x30a   :  { %1118 = vst [vmem:[%s2726_s2 + $0x490] sm:$0xff] %v925_v35 }
 0x30b   :  { %1119 = vst.msk [vmem:[%s2726_s2 + $0x498] sm:$0xff] %vm972_vm0, %v926_v36 }
 0x312   :  { %v279_v39 = vld [vmem:[%s2725_s1 + $0x560] sm:$0xff]  ;;  %v280_v40 = vld [vmem:[%s2725_s1 + $0x568] sm:$0xff] }
 0x313   :  { %1116 = vst [vmem:[%s2726_s2 + $0x480] sm:$0xff] %v923_v37  ;;  %v951_v45 = vmul.f32 %v732_v43, %v279_v39  ;;  %v952_v46 = vmul.f32 %v732_v43, %v280_v40  ;;  %v742_v39 = vpop.permute.xlu1 %741  ;;  %v737_v40 = vpop.permute.xlu0 %736 }
 0x31a   :  { %v259_v41 = vld [vmem:[%s2725_s1 + $0x4c0] sm:$0xff]  ;;  %v260_v42 = vld [vmem:[%s2725_s1 + $0x4c8] sm:$0xff] }
 0x31b   :  { %1117 = vst.msk [vmem:[%s2726_s2 + $0x488] sm:$0xff] %vm972_vm0, %v924_v38  ;;  %v931_v50 = vmul.f32 %v682_v47, %v259_v41  ;;  %v932_v51 = vmul.f32 %v682_v47, %v260_v42 }
 0x322   :  { %v257_v44 = vld [vmem:[%s2725_s1 + $0x4b0] sm:$0xff]  ;;  %v258_v48 = vld [vmem:[%s2725_s1 + $0x4b8] sm:$0xff] }
 0x323   :  { %1144 = vst [vmem:[%s2726_s2 + $0x560] sm:$0xff] %v951_v45  ;;  %v929_v52 = vmul.f32 %v677_v49, %v257_v44  ;;  %v930_v53 = vmul.f32 %v677_v49, %v258_v48  ;;  %v757_v49 = vpop.permute.xlu1 %756 }
 0x324   :  { %1145 = vst.msk [vmem:[%s2726_s2 + $0x568] sm:$0xff] %vm972_vm0, %v952_v46 }
 0x325   :  { %1124 = vst [vmem:[%s2726_s2 + $0x4c0] sm:$0xff] %v931_v50  ;;  %v752_v50 = vpop.permute.xlu0 %751 }
 0x326   :  { %1125 = vst.msk [vmem:[%s2726_s2 + $0x4c8] sm:$0xff] %vm972_vm0, %v932_v51 }
 0x32d   :  { %v285_v54 = vld [vmem:[%s2725_s1 + $0x590] sm:$0xff]  ;;  %v286_v55 = vld [vmem:[%s2725_s1 + $0x598] sm:$0xff] }
 0x32e   :  { %1122 = vst [vmem:[%s2726_s2 + $0x4b0] sm:$0xff] %v929_v52  ;;  %v957_v60 = vmul.f32 %v747_v58, %v285_v54  ;;  %v958_v61 = vmul.f32 %v747_v58, %v286_v55 }
 0x335   :  { %v265_v56 = vld [vmem:[%s2725_s1 + $0x4f0] sm:$0xff]  ;;  %v266_v57 = vld [vmem:[%s2725_s1 + $0x4f8] sm:$0xff] }
 0x336   :  { %1123 = vst.msk [vmem:[%s2726_s2 + $0x4b8] sm:$0xff] %vm972_vm0, %v930_v53  ;;  %v937_v1 = vmul.f32 %v697_v62, %v265_v56  ;;  %v938_v2 = vmul.f32 %v697_v62, %v266_v57 }
 0x33d   :  { %v263_v59 = vld [vmem:[%s2725_s1 + $0x4e0] sm:$0xff]  ;;  %v264_v63 = vld [vmem:[%s2725_s1 + $0x4e8] sm:$0xff] }
 0x33e   :  { %1150 = vst [vmem:[%s2726_s2 + $0x590] sm:$0xff] %v957_v60  ;;  %v935_v3 = vmul.f32 %v692_v0, %v263_v59  ;;  %v936_v4 = vmul.f32 %v692_v0, %v264_v63  ;;  %v772_v59 = vpop.permute.xlu1 %771  ;;  %v767_v60 = vpop.permute.xlu0 %766 }
 0x33f   :  { %1151 = vst.msk [vmem:[%s2726_s2 + $0x598] sm:$0xff] %vm972_vm0, %v958_v61 }
 0x340   :  { %1130 = vst [vmem:[%s2726_s2 + $0x4f0] sm:$0xff] %v937_v1 }
 0x341   :  { %1131 = vst.msk [vmem:[%s2726_s2 + $0x4f8] sm:$0xff] %vm972_vm0, %v938_v2 }
 0x348   :  { %v291_v5 = vld [vmem:[%s2725_s1 + $0x5c0] sm:$0xff]  ;;  %v292_v6 = vld [vmem:[%s2725_s1 + $0x5c8] sm:$0xff] }
 0x349   :  { %1128 = vst [vmem:[%s2726_s2 + $0x4e0] sm:$0xff] %v935_v3  ;;  %v963_v11 = vmul.f32 %v762_v9, %v291_v5  ;;  %v964_v12 = vmul.f32 %v762_v9, %v292_v6 }
 0x350   :  { %v271_v7 = vld [vmem:[%s2725_s1 + $0x520] sm:$0xff]  ;;  %v272_v8 = vld [vmem:[%s2725_s1 + $0x528] sm:$0xff] }
 0x351   :  { %1129 = vst.msk [vmem:[%s2726_s2 + $0x4e8] sm:$0xff] %vm972_vm0, %v936_v4  ;;  %v943_v16 = vmul.f32 %v712_v13, %v271_v7  ;;  %v944_v17 = vmul.f32 %v712_v13, %v272_v8 }
 0x358   :  { %v269_v10 = vld [vmem:[%s2725_s1 + $0x510] sm:$0xff]  ;;  %v270_v14 = vld [vmem:[%s2725_s1 + $0x518] sm:$0xff] }
 0x359   :  { %1156 = vst [vmem:[%s2726_s2 + $0x5c0] sm:$0xff] %v963_v11  ;;  %v941_v18 = vmul.f32 %v707_v15, %v269_v10  ;;  %v942_v19 = vmul.f32 %v707_v15, %v270_v14 }
 0x35a   :  { %1157 = vst.msk [vmem:[%s2726_s2 + $0x5c8] sm:$0xff] %vm972_vm0, %v964_v12 }
 0x35b   :  { %1136 = vst [vmem:[%s2726_s2 + $0x520] sm:$0xff] %v943_v16 }
 0x35c   :  { %1137 = vst.msk [vmem:[%s2726_s2 + $0x528] sm:$0xff] %vm972_vm0, %v944_v17 }
 0x363   :  { %v297_v20 = vld [vmem:[%s2725_s1 + $0x5f0] sm:$0xff]  ;;  %v298_v21 = vld [vmem:[%s2725_s1 + $0x5f8] sm:$0xff] }
 0x364   :  { %1134 = vst [vmem:[%s2726_s2 + $0x510] sm:$0xff] %v941_v18  ;;  %v969_v26 = vmul.f32 %v777_v24, %v297_v20  ;;  %v970_v27 = vmul.f32 %v777_v24, %v298_v21 }
 0x36b   :  { %v277_v22 = vld [vmem:[%s2725_s1 + $0x550] sm:$0xff]  ;;  %v278_v23 = vld [vmem:[%s2725_s1 + $0x558] sm:$0xff] }
 0x36c   :  { %1135 = vst.msk [vmem:[%s2726_s2 + $0x518] sm:$0xff] %vm972_vm0, %v942_v19  ;;  %v949_v31 = vmul.f32 %v727_v28, %v277_v22  ;;  %v950_v32 = vmul.f32 %v727_v28, %v278_v23 }
 0x373   :  { %v275_v25 = vld [vmem:[%s2725_s1 + $0x540] sm:$0xff]  ;;  %v276_v29 = vld [vmem:[%s2725_s1 + $0x548] sm:$0xff] }
 0x374   :  { %1162 = vst [vmem:[%s2726_s2 + $0x5f0] sm:$0xff] %v969_v26  ;;  %v947_v33 = vmul.f32 %v722_v30, %v275_v25  ;;  %v948_v34 = vmul.f32 %v722_v30, %v276_v29 }
 0x375   :  { %1163 = vst.msk [vmem:[%s2726_s2 + $0x5f8] sm:$0xff] %vm972_vm0, %v970_v27 }
 0x376   :  { %1142 = vst [vmem:[%s2726_s2 + $0x550] sm:$0xff] %v949_v31 }
 0x377   :  { %1143 = vst.msk [vmem:[%s2726_s2 + $0x558] sm:$0xff] %vm972_vm0, %v950_v32 }
 0x378   :  { %1140 = vst [vmem:[%s2726_s2 + $0x540] sm:$0xff] %v947_v33 }
 0x37f   :  { %v283_v35 = vld [vmem:[%s2725_s1 + $0x580] sm:$0xff]  ;;  %v284_v36 = vld [vmem:[%s2725_s1 + $0x588] sm:$0xff]  ;;  %v281_v37 = vld [vmem:[%s2725_s1 + $0x570] sm:$0xff] }
 0x380   :  { %1141 = vst.msk [vmem:[%s2726_s2 + $0x548] sm:$0xff] %vm972_vm0, %v948_v34  ;;  %v955_v41 = vmul.f32 %v742_v39, %v283_v35  ;;  %v956_v42 = vmul.f32 %v742_v39, %v284_v36  ;;  %v953_v43 = vmul.f32 %v737_v40, %v281_v37 }
 0x387   :  { %v282_v38 = vld [vmem:[%s2725_s1 + $0x578] sm:$0xff] }
 0x388   :  { %v954_v44 = vmul.f32 %v737_v40, %v282_v38  ;;  %1148 = vst [vmem:[%s2726_s2 + $0x580] sm:$0xff] %v955_v41 }
 0x389   :  { %1149 = vst.msk [vmem:[%s2726_s2 + $0x588] sm:$0xff] %vm972_vm0, %v956_v42 }
 0x38a   :  { %1146 = vst [vmem:[%s2726_s2 + $0x570] sm:$0xff] %v953_v43 }
 0x38b   :  { %1147 = vst.msk [vmem:[%s2726_s2 + $0x578] sm:$0xff] %vm972_vm0, %v954_v44 }
 0x392   :  { %v289_v45 = vld [vmem:[%s2725_s1 + $0x5b0] sm:$0xff]  ;;  %v290_v46 = vld [vmem:[%s2725_s1 + $0x5b8] sm:$0xff]  ;;  %v287_v47 = vld [vmem:[%s2725_s1 + $0x5a0] sm:$0xff] }
 0x393   :  { %v288_v48 = vld [vmem:[%s2725_s1 + $0x5a8] sm:$0xff]  ;;  %v961_v51 = vmul.f32 %v757_v49, %v289_v45  ;;  %v962_v52 = vmul.f32 %v757_v49, %v290_v46  ;;  %v959_v53 = vmul.f32 %v752_v50, %v287_v47 }
 0x394   :  { %v960_v54 = vmul.f32 %v752_v50, %v288_v48 }
 0x395   :  { %1154 = vst [vmem:[%s2726_s2 + $0x5b0] sm:$0xff] %v961_v51 }
 0x396   :  { %1155 = vst.msk [vmem:[%s2726_s2 + $0x5b8] sm:$0xff] %vm972_vm0, %v962_v52 }
 0x397   :  { %1152 = vst [vmem:[%s2726_s2 + $0x5a0] sm:$0xff] %v959_v53 }
 0x398   :  { %1153 = vst.msk [vmem:[%s2726_s2 + $0x5a8] sm:$0xff] %vm972_vm0, %v960_v54 }
 0x39f   :  { %v295_v55 = vld [vmem:[%s2725_s1 + $0x5e0] sm:$0xff]  ;;  %v296_v56 = vld [vmem:[%s2725_s1 + $0x5e8] sm:$0xff]  ;;  %v293_v57 = vld [vmem:[%s2725_s1 + $0x5d0] sm:$0xff] }
 0x3a0   :  { %v294_v58 = vld [vmem:[%s2725_s1 + $0x5d8] sm:$0xff]  ;;  %v967_v61 = vmul.f32 %v772_v59, %v295_v55  ;;  %v968_v62 = vmul.f32 %v772_v59, %v296_v56  ;;  %v965_v63 = vmul.f32 %v767_v60, %v293_v57 }
 0x3a1   :  { %v966_v0 = vmul.f32 %v767_v60, %v294_v58 }
 0x3a2   :  { %1160 = vst [vmem:[%s2726_s2 + $0x5e0] sm:$0xff] %v967_v61 }
 0x3a3   :  { %1161 = vst.msk [vmem:[%s2726_s2 + $0x5e8] sm:$0xff] %vm972_vm0, %v968_v62 }
 0x3a4   :  { %1158 = vst [vmem:[%s2726_s2 + $0x5d0] sm:$0xff] %v965_v63 }
 0x3a5   :  { %1159 = vst.msk [vmem:[%s2726_s2 + $0x5d8] sm:$0xff] %vm972_vm0, %v966_v0 }

</bundles_post_ra>
